<compile_context>
chip_gen: v5e
topology: v5e:2x2
jax: 0.10.0
libtpu: 0.0.40
codegen_flags: <defaults>
</compile_context>

<pallas_src>
import math

import jax
import jax.numpy as jnp
from jax.experimental import pallas as pl
from jax.experimental.pallas import tpu as pltpu


def _pe_add_kernel(x_ref, pe_ref, o_ref):
    # Pure VPU elementwise add on one (tile_rows, tile_cols) VMEM block.
    o_ref[...] = x_ref[...] + pe_ref[...]


def make_positional_encoding_table(d_model: int, data_len: int = 500) -> jnp.ndarray:
    """Deterministic sinusoidal PE table, shape (data_len, 1, d_model), float32."""
    if d_model % 2 != 0:
        raise ValueError("d_model must be even (same constraint as the PyTorch module).")
    position = jnp.arange(data_len, dtype=jnp.float32)[:, None]              # (L, 1)
    div_term = jnp.exp(
        jnp.arange(0, d_model, 2, dtype=jnp.float32) * (-math.log(10000.0) / d_model)
    )                                                                         # (D/2,)
    ang = position * div_term                                                 # (L, D/2)
    pe = jnp.zeros((data_len, d_model), dtype=jnp.float32)
    pe = pe.at[:, 0::2].set(jnp.sin(ang))
    pe = pe.at[:, 1::2].set(jnp.cos(ang))
    return pe[:, None, :]                                                     # (L, 1, D)


# Per-buffer block target.  3 arrays x 2 pipeline buffers x 2 MiB ~= 12 MiB,
# under the 16 MiB scoped-VMEM default on v5e (and 32 MiB on v6e/v7x).
_TARGET_BLOCK_BYTES = 2 * 1024 * 1024


def positional_encoding_forward(x: jnp.ndarray, pe_table: jnp.ndarray) -> jnp.ndarray:
    """x: (S, B, D); returns x + pe_table[:S] (broadcast over batch) via Pallas."""
    s, b, d = x.shape
    data_len = pe_table.shape[0]
    if s > data_len:
        raise ValueError(f"seq_len {s} exceeds positional-encoding table length {data_len}")

    dtype = x.dtype
    itemsize = jnp.dtype(dtype).itemsize

    # pe in the compute dtype (no f32 promotion inside the kernel).
    pe_slice = pe_table[:s].astype(dtype)                 # (S, 1, D)
    pe_full = jnp.broadcast_to(pe_slice, (s, b, d))       # (S, B, D) -- layout plumbing

    # ---- lane/sublane-dense 2-D presentation of the N elements -------------
    n = s * b * d
    if (b * d) % 128 == 0:
        rows, cols = s, b * d            # S on sublanes, batch folded into lanes
    elif n % 128 == 0:
        rows, cols = n // 128, 128       # fully flattened, lane-dense
    else:
        rows, cols = s, b * d            # tiny/odd shapes: masked stores, still correct

    x2 = x.reshape(rows, cols)           # contiguous reshape: no transpose needed
    pe2 = pe_full.reshape(rows, cols)

    # ---- block sizing: biggest ~2 MiB block respecting the (8, 128) rule ----
    if cols % 128 == 0 and cols * 8 * itemsize > _TARGET_BLOCK_BYTES:
        tile_cols = max(128, (_TARGET_BLOCK_BYTES // (8 * itemsize)) // 128 * 128)
    else:
        tile_cols = cols                                       # full extent
    row_budget = max(1, _TARGET_BLOCK_BYTES // (tile_cols * itemsize))
    if rows <= 8 or row_budget >= rows:
        tile_rows = rows                                       # full extent
    else:
        tile_rows = max(8, (row_budget // 8) * 8)              # multiple of 8 sublanes

    grid = (pl.cdiv(rows, tile_rows), pl.cdiv(cols, tile_cols))

    def _spec():
        return pl.BlockSpec((tile_rows, tile_cols), lambda i, j: (i, j))

    out2 = pl.pallas_call(
        _pe_add_kernel,
        out_shape=jax.ShapeDtypeStruct((rows, cols), dtype),
        grid=grid,
        in_specs=[_spec(), _spec()],
        out_specs=_spec(),
        input_output_aliases={0: 0},     # reuse / donate x's buffer for the output
        compiler_params=pltpu.CompilerParams(
            dimension_semantics=("parallel", "parallel"),
        ),
    )(x2, pe2)

    return out2.reshape(s, b, d)


if __name__ == "__main__":
    # Small shapes consistent with the module's forward: x is (seq, batch, d_model).
    SEQ, BATCH, D_MODEL = 8, 2, 32
    DATA_LEN = 500

    key = jax.random.PRNGKey(0)
    x = jax.random.normal(key, (SEQ, BATCH, D_MODEL), dtype=jnp.float32)

    pe_table = make_positional_encoding_table(D_MODEL, DATA_LEN)

    # Plain-JAX reference of the PyTorch forward (computed before the kernel
    # call so buffer aliasing cannot interfere with the check).
    ref = x + pe_table[:SEQ]

    out = positional_encoding_forward(x, pe_table)
    out = jax.block_until_ready(out)

    assert out.shape == (SEQ, BATCH, D_MODEL)
    assert jnp.allclose(out, ref, atol=1e-6), "mismatch vs reference"
    print("KERNEL_OK")
</pallas_src>

<mosaic_0001>
module attributes {stable_mosaic.version = 11 : i64} {
  func.func @_pe_add_kernel(%arg0: i32, %arg1: i32, %arg2: memref<4x128xf32, #tpu.memory_space<vmem>>, %arg3: memref<4x128xf32, #tpu.memory_space<vmem>>, %arg4: memref<4x128xf32, #tpu.memory_space<vmem>>) attributes {dimension_semantics = [#tpu.dimension_semantics<parallel>, #tpu.dimension_semantics<parallel>], iteration_bounds = array<i64: 1, 1>, scalar_prefetch = 0 : i64, scratch_operands = 0 : i64, tpu.core_type = #tpu.core_type<tc>, window_params = [{transform_indices = @transform_0, window_bounds = array<i64: 4, 128>}, {transform_indices = @transform_1, window_bounds = array<i64: 4, 128>}, {transform_indices = @transform_2, window_bounds = array<i64: 4, 128>}]} {
    %c0 = arith.constant 0 : index
    %c0_0 = arith.constant 0 : index
    %0 = vector.load %arg2[%c0, %c0_0] : memref<4x128xf32, #tpu.memory_space<vmem>>, vector<4x128xf32>
    %c0_1 = arith.constant 0 : index
    %c0_2 = arith.constant 0 : index
    %1 = vector.load %arg3[%c0_1, %c0_2] : memref<4x128xf32, #tpu.memory_space<vmem>>, vector<4x128xf32>
    %2 = arith.addf %0, %1 : vector<4x128xf32>
    %c0_3 = arith.constant 0 : index
    %c0_4 = arith.constant 0 : index
    %3 = vector.load %arg4[%c0_3, %c0_4] : memref<4x128xf32, #tpu.memory_space<vmem>>, vector<4x128xf32>
    tpu.vector_store %arg4[%c0_3, %c0_4], %2 {strides = array<i32>} : memref<4x128xf32, #tpu.memory_space<vmem>>, vector<4x128xf32>,
    return
  }
  func.func @transform_0(%arg0: i32, %arg1: i32) -> (i32, i32) {
    %c0_i32 = arith.constant 0 : i32
    return %arg0, %arg1 : i32, i32
  }
  func.func @transform_1(%arg0: i32, %arg1: i32) -> (i32, i32) {
    %c0_i32 = arith.constant 0 : i32
    return %arg0, %arg1 : i32, i32
  }
  func.func @transform_2(%arg0: i32, %arg1: i32) -> (i32, i32) {
    %c0_i32 = arith.constant 0 : i32
    return %arg0, %arg1 : i32, i32
  }
}

</mosaic_0001>

<bundles_post_ra>
// kernel: tpu_custom_call.1
= control target key start
LH: loop header
LB: loop body
LE: loop exit
PB: predicated region body
PF: predicated region fallthrough
CT: control target
= control target key end

     0   :  { %7 = vsyncpa [#allocation3], 0  ;;  %s127_s0 = inlined_call_operand.hbm [shape: f32[4,128], index: 0, kind: input, shape index: {}, may-alias: {0,2}]   ;;  %s128_s1 = inlined_call_operand.vmem [shape: f32[4,128], index: 1, kind: input, shape index: {}]   ;;  %s129_s2 = inlined_call_operand.hbm [shape: f32[4,128], index: 2, kind: output, shape index: {}, may-alias: {0,2}]  }
   0x1   :  { %8 = vsyncpa [#allocation4], 0  ;;  %s14_s11 = sshll.u32 %s127_s0, 4  ;;  %s101_s12 = smov [#allocation2]   ;;  %s15_s11 = int_to_ptr.hbm [resolvable:$true] %s14_s11 }
   0x2   :  { %s16_s13 = sshll.u32 %s101_s12, 4  ;;  %s17_s13 = int_to_ptr.vmem [resolvable:$true] %s16_s13 }
   0x3   :  { %19 = dma.hbm_to_vmem [thread:$0]  %s15_s11, 64, %s17_s13, [#allocation3]  }
   0x4   :  { %97 = dma.done.wait [#allocation3], 64  }
   0x5   :  { %98 = vsyncadd [#allocation3], 4294967232  ;;  %s102_s14 = smov [#allocation5]   ;;  %s37_s18 = sshll.u32 %s129_s2, 4  ;;  %v26_v0 = vld [vmem:[#allocation2] sm:$0xf]  ;;  %s38_s18 = int_to_ptr.hbm [resolvable:$true] %s37_s18 }
   0x6   :  { %s35_s15 = sshll.u32 %s102_s14, 4  ;;  %v27_v1 = vld [vmem:[%s128_s1] sm:$0xf]  ;;  %s36_s15 = int_to_ptr.vmem [resolvable:$true] %s35_s15 }
   0x7   :  { %v28_v2 = vadd.f32 %v27_v1, %v26_v0 }
   0x9   :  { %29 = vst [vmem:[#allocation5] sm:$0xf] %v28_v2 }
   0xa   :  { %40 = dma.vmem_to_hbm [thread:$0]  %s36_s15, 64, %s38_s18, [#allocation4]  }
   0xb   :  { %99 = dma.done.wait [#allocation4], 64  }
   0xc   :  { %100 = vsyncadd [#allocation4], 4294967232 }
   0xd   :  { %45 = vsyncpa [#allocation3], 1 }
   0xe   :  { %46 = vsyncpa [#allocation4], 1 }

</bundles_post_ra>
